<compile_context>
chip_gen: v6e
topology: v6e:2x2x1
jax: 0.10.0
libtpu: 0.0.40
codegen_flags: <defaults>
</compile_context>

<pallas_src>
import numpy as np
import jax
import jax.numpy as jnp
from jax.experimental import pallas as pl
from jax.experimental.pallas import tpu as pltpu


def _cdiv(a, b):
    return (a + b - 1) // b


def _round_up(x, m):
    return ((x + m - 1) // m) * m


def _choose_block_n(rows_per_split, num_classes):
    """Pick a row-tile size from a conservative VMEM budget.

    Budget accounts for the double-buffered logits tile plus in-kernel f32
    temporaries and the vector accumulator; 10 MiB keeps us safely inside the
    v5e 16 MiB scoped default and well inside v7x's 64 MiB physical VMEM.
    """
    lanes = _round_up(max(num_classes, 1), 128)   # lane-padded width of the logits tile
    vmem_budget = 10 * 1024 * 1024
    per_row_bytes = 8 * lanes * 4                  # 2 input buffers + ~6 f32 temporaries/acc
    bn = vmem_budget // per_row_bytes
    bn = (bn // 8) * 8                             # sublane multiple
    bn = max(8, min(bn, 2048))
    bn = min(bn, _round_up(max(rows_per_split, 1), 8))
    return bn


def _make_dwb_kernel(total_n, block_n):
    def kernel(logits_ref, targets_ref, logbeta_ref, out_ref, acc_ref):
        c = pl.program_id(0)          # split (TensorCore) index
        i = pl.program_id(1)          # row-tile index within the split
        n_tiles = pl.num_programs(1)

        @pl.when(i == 0)
        def _():
            acc_ref[...] = jnp.zeros_like(acc_ref)

        # Native-dtype tile in VMEM; cast to f32 on the VPU (free vs. HBM traffic).
        logits = logits_ref[...].astype(jnp.float32)            # [bn, C]
        tgt = targets_ref[...]                                   # [bn, 1] int32
        logbeta_t = logbeta_ref[...]                             # [bn, 1] f32 = log(beta[target])

        # one-hot of targets from an iota over the class axis
        col = jax.lax.broadcasted_iota(jnp.int32, logits.shape, 1)
        onehot = (col == tgt).astype(jnp.float32)                # [bn, C]

        # numerically-stable cross entropy per sample
        m = jnp.max(logits, axis=-1, keepdims=True)              # [bn, 1]
        lse = m + jnp.log(jnp.sum(jnp.exp(logits - m), axis=-1, keepdims=True))
        logit_t = jnp.sum(logits * onehot, axis=-1, keepdims=True)
        ce = lse - logit_t                                        # [bn, 1]

        pt = jnp.exp(-ce)                                         # [bn, 1]
        # beta_t ** (1 - pt) == exp((1 - pt) * log(beta_t)); beta >= 1 so log (precomputed) is safe
        loss = jnp.exp((1.0 - pt) * logbeta_t) * ce               # [bn, 1]

        # Mask rows that are padding (keeps block_n a pure perf choice).
        row = jax.lax.broadcasted_iota(jnp.int32, (block_n, 1), 0)
        start = (c * n_tiles + i) * block_n
        loss = jnp.where(start + row < total_n, loss, 0.0)

        # Vector accumulator: plain VPU add per tile, no per-step XLU reduce.
        acc_ref[...] += loss

        @pl.when(i == n_tiles - 1)
        def _():
            # Single cross-lane/sublane reduce per split; lane-dense (8,128) store.
            out_ref[...] = jnp.full(out_ref.shape, jnp.sum(acc_ref[...]), out_ref.dtype)

    return kernel


def dwb_loss_pallas(logits, targets, beta, *, reduction="mean", num_splits=2):
    """logits: [N, C] (any float dtype), targets: [N] int, beta: [C] float -> scalar."""
    N, C = logits.shape
    rows_per_split = _cdiv(N, num_splits)
    block_n = _choose_block_n(rows_per_split, C)
    n_tiles = _cdiv(rows_per_split, block_n)
    n_pad = num_splits * n_tiles * block_n

    targets = targets.astype(jnp.int32)
    # Pre-gather log(beta)[targets] in the wrapper (O(N) gather, drops an in-kernel
    # [tN, C] reduce + per-row log).
    logbeta_t = jnp.log(beta.astype(jnp.float32))[targets]       # [N]

    pad_rows = n_pad - N
    if pad_rows:
        logits_p = jnp.pad(logits, ((0, pad_rows), (0, 0)))
        targets_p = jnp.pad(targets, (0, pad_rows))
        logbeta_p = jnp.pad(logbeta_t, (0, pad_rows))
    else:
        logits_p, targets_p, logbeta_p = logits, targets, logbeta_t

    targets2d = targets_p.reshape(n_pad, 1)
    logbeta2d = logbeta_p.reshape(n_pad, 1).astype(jnp.float32)

    row_block = lambda c, i: (c * n_tiles + i, 0)

    partials = pl.pallas_call(
        _make_dwb_kernel(N, block_n),
        out_shape=jax.ShapeDtypeStruct((num_splits, 8, 128), jnp.float32),
        grid_spec=pltpu.PrefetchScalarGridSpec(
            num_scalar_prefetch=0,
            grid=(num_splits, n_tiles),
            in_specs=[
                pl.BlockSpec((block_n, C), row_block),   # logits, native dtype
                pl.BlockSpec((block_n, 1), row_block),   # targets
                pl.BlockSpec((block_n, 1), row_block),   # log(beta[target])
            ],
            out_specs=pl.BlockSpec((1, 8, 128), lambda c, i: (c, 0, 0)),
            scratch_shapes=[pltpu.VMEM((block_n, 1), jnp.float32)],
        ),
        compiler_params=pltpu.CompilerParams(
            # Outer axis parallel -> both v7x TensorCores; inner axis carries the
            # per-split accumulator so it must be arbitrary (and last).
            dimension_semantics=("parallel", "arbitrary"),
            vmem_limit_bytes=32 * 1024 * 1024,
        ),
    )(logits_p, targets2d, logbeta2d)

    total = jnp.sum(partials[:, 0, 0])
    if reduction == "mean":
        return (total / jnp.float32(N)).reshape(())
    elif reduction == "sum":
        return total.reshape(())
    else:
        # TODO(synk): reduction='none' (per-sample losses) not wired through the
        # Pallas path; only the fused 'mean'/'sum' reductions are implemented.
        raise NotImplementedError("only reduction in {'mean', 'sum'} is supported")


def dwb_loss_ref(logits, targets, beta):
    # pure-JAX reference mirroring the PyTorch forward
    logp = jax.nn.log_softmax(logits.astype(jnp.float32), axis=-1)
    ce = -jnp.take_along_axis(logp, targets[:, None], axis=-1)[:, 0]
    pt = jnp.exp(-ce)
    loss = beta[targets] ** (1.0 - pt) * ce
    return jnp.mean(loss)


if __name__ == "__main__":
    # deterministic parameter setup (module __init__): beta from cls_num_list
    num_classes = 4
    batch = 8
    cls_num_list = np.array([100.0, 50.0, 10.0, 5.0], dtype=np.float32)
    beta_np = np.log(cls_num_list.max() / cls_num_list) + 1.0
    beta = jnp.asarray(beta_np, dtype=jnp.float32)

    key = jax.random.PRNGKey(0)
    k1, k2 = jax.random.split(key)
    logits = jax.random.normal(k1, (batch, num_classes), dtype=jnp.float32)
    targets = jax.random.randint(k2, (batch,), 0, num_classes, dtype=jnp.int32)

    out = dwb_loss_pallas(logits, targets, beta)
    out = jax.block_until_ready(out)

    ref = dwb_loss_ref(logits, targets, beta)
    np.testing.assert_allclose(np.asarray(out), np.asarray(ref), rtol=1e-5, atol=1e-5)

    print("KERNEL_OK")
</pallas_src>

<mosaic_0001>
module attributes {stable_mosaic.version = 11 : i64} {
  func.func @kernel(%arg0: i32, %arg1: i32, %arg2: memref<8x4xf32, #tpu.memory_space<vmem>>, %arg3: memref<8x1xi32, #tpu.memory_space<vmem>>, %arg4: memref<8x1xf32, #tpu.memory_space<vmem>>, %arg5: memref<1x8x128xf32, #tpu.memory_space<vmem>>, %arg6: memref<8x1xf32, #tpu.memory_space<vmem>>) attributes {dimension_semantics = [#tpu.dimension_semantics<parallel>, #tpu.dimension_semantics<arbitrary>], iteration_bounds = array<i64: 2, 1>, scalar_prefetch = 0 : i64, scratch_operands = 1 : i64, tpu.core_type = #tpu.core_type<tc>, window_params = [{transform_indices = @transform_0, window_bounds = array<i64: 8, 4>}, {transform_indices = @transform_1, window_bounds = array<i64: 8, 1>}, {transform_indices = @transform_2, window_bounds = array<i64: 8, 1>}, {transform_indices = @transform_3, window_bounds = array<i64: 1, 8, 128>}]} {
    %c0_i32 = arith.constant 0 : i32
    %0 = arith.cmpi eq, %arg1, %c0_i32 : i32
    %1 = arith.extui %0 : i1 to i32
    %c0_i32_0 = arith.constant 0 : i32
    %2 = arith.cmpi ne, %1, %c0_i32_0 : i32
    scf.if %2 {
      %cst_18 = arith.constant 0.000000e+00 : f32
      %48 = vector.broadcast %cst_18 : f32 to vector<8x1xf32>
      %c0_19 = arith.constant 0 : index
      %c0_20 = arith.constant 0 : index
      %49 = vector.load %arg6[%c0_19, %c0_20] : memref<8x1xf32, #tpu.memory_space<vmem>>, vector<8x1xf32>
      tpu.vector_store %arg6[%c0_19, %c0_20], %48 {strides = array<i32>} : memref<8x1xf32, #tpu.memory_space<vmem>>, vector<8x1xf32>,
    } else {
    }
    %c0 = arith.constant 0 : index
    %c0_1 = arith.constant 0 : index
    %3 = vector.load %arg2[%c0, %c0_1] : memref<8x4xf32, #tpu.memory_space<vmem>>, vector<8x4xf32>
    %c0_2 = arith.constant 0 : index
    %c0_3 = arith.constant 0 : index
    %4 = vector.load %arg3[%c0_2, %c0_3] : memref<8x1xi32, #tpu.memory_space<vmem>>, vector<8x1xi32>
    %c0_4 = arith.constant 0 : index
    %c0_5 = arith.constant 0 : index
    %5 = vector.load %arg4[%c0_4, %c0_5] : memref<8x1xf32, #tpu.memory_space<vmem>>, vector<8x1xf32>
    %6 = tpu.iota {dimensions = array<i32: 1>} : vector<8x4xi32>
    %7 = vector.broadcast %4 : vector<8x1xi32> to vector<8x4xi32>
    %8 = arith.cmpi eq, %6, %7 : vector<8x4xi32>
    %9 = arith.extui %8 : vector<8x4xi1> to vector<8x4xi32>
    %10 = arith.sitofp %9 : vector<8x4xi32> to vector<8x4xf32>
    %cst = arith.constant dense<0xFF800000> : vector<8xf32>
    %11 = vector.multi_reduction <maximumf>, %3, %cst [1] : vector<8x4xf32> to vector<8xf32>
    %12 = vector.shape_cast %11 : vector<8xf32> to vector<8x1xf32>
    %13 = vector.broadcast %12 : vector<8x1xf32> to vector<8x4xf32>
    %14 = arith.subf %3, %13 : vector<8x4xf32>
    %15 = math.exp %14 : vector<8x4xf32>
    %cst_6 = arith.constant dense<0.000000e+00> : vector<8xf32>
    %16 = vector.multi_reduction <add>, %15, %cst_6 [1] : vector<8x4xf32> to vector<8xf32>
    %17 = vector.shape_cast %16 : vector<8xf32> to vector<8x1xf32>
    %18 = math.log %17 : vector<8x1xf32>
    %19 = arith.addf %12, %18 : vector<8x1xf32>
    %20 = arith.mulf %3, %10 : vector<8x4xf32>
    %cst_7 = arith.constant dense<0.000000e+00> : vector<8xf32>
    %21 = vector.multi_reduction <add>, %20, %cst_7 [1] : vector<8x4xf32> to vector<8xf32>
    %22 = vector.shape_cast %21 : vector<8xf32> to vector<8x1xf32>
    %23 = arith.subf %19, %22 : vector<8x1xf32>
    %cst_8 = arith.constant 0.000000e+00 : f32
    %24 = vector.broadcast %cst_8 : f32 to vector<8x1xf32>
    %25 = arith.subf %24, %23 : vector<8x1xf32>
    %26 = math.exp %25 : vector<8x1xf32>
    %cst_9 = arith.constant 1.000000e+00 : f32
    %27 = vector.broadcast %cst_9 : f32 to vector<8x1xf32>
    %28 = arith.subf %27, %26 : vector<8x1xf32>
    %29 = arith.mulf %28, %5 : vector<8x1xf32>
    %30 = math.exp %29 : vector<8x1xf32>
    %31 = arith.mulf %30, %23 : vector<8x1xf32>
    %32 = tpu.iota {dimensions = array<i32: 0>} : vector<8x1xi32>
    %c1_i32 = arith.constant 1 : i32
    %33 = arith.muli %arg0, %c1_i32 : i32
    %34 = arith.addi %33, %arg1 : i32
    %c8_i32 = arith.constant 8 : i32
    %35 = arith.muli %34, %c8_i32 : i32
    %36 = vector.broadcast %35 : i32 to vector<8x1xi32>
    %37 = arith.addi %36, %32 : vector<8x1xi32>
    %c8_i32_10 = arith.constant 8 : i32
    %38 = vector.broadcast %c8_i32_10 : i32 to vector<8x1xi32>
    %39 = arith.cmpi slt, %37, %38 : vector<8x1xi32>
    %cst_11 = arith.constant 0.000000e+00 : f32
    %40 = vector.broadcast %cst_11 : f32 to vector<8x1xf32>
    %41 = arith.select %39, %31, %40 : vector<8x1xi1>, vector<8x1xf32>
    %c0_12 = arith.constant 0 : index
    %c0_13 = arith.constant 0 : index
    %42 = vector.load %arg6[%c0_12, %c0_13] : memref<8x1xf32, #tpu.memory_space<vmem>>, vector<8x1xf32>
    %43 = arith.addf %42, %41 : vector<8x1xf32>
    %c0_14 = arith.constant 0 : index
    %c0_15 = arith.constant 0 : index
    %44 = vector.load %arg6[%c0_14, %c0_15] : memref<8x1xf32, #tpu.memory_space<vmem>>, vector<8x1xf32>
    tpu.vector_store %arg6[%c0_14, %c0_15], %43 {strides = array<i32>} : memref<8x1xf32, #tpu.memory_space<vmem>>, vector<8x1xf32>,
    %c0_i32_16 = arith.constant 0 : i32
    %45 = arith.cmpi eq, %arg1, %c0_i32_16 : i32
    %46 = arith.extui %45 : i1 to i32
    %c0_i32_17 = arith.constant 0 : i32
    %47 = arith.cmpi ne, %46, %c0_i32_17 : i32
    scf.if %47 {
      %c0_18 = arith.constant 0 : index
      %c0_19 = arith.constant 0 : index
      %48 = vector.load %arg6[%c0_18, %c0_19] : memref<8x1xf32, #tpu.memory_space<vmem>>, vector<8x1xf32>
      %49 = vector.shape_cast %48 : vector<8x1xf32> to vector<1x8x1xf32>
      %cst_20 = arith.constant dense<0.000000e+00> : vector<1xf32>
      %50 = vector.multi_reduction <add>, %49, %cst_20 [1, 2] : vector<1x8x1xf32> to vector<1xf32>
      %51 = vector.shape_cast %50 : vector<1xf32> to vector<1x1x1xf32>
      %52 = vector.extract %51[0, 0, 0] : f32 from vector<1x1x1xf32>
      %53 = vector.broadcast %52 : f32 to vector<1x8x128xf32>
      %c0_21 = arith.constant 0 : index
      %c0_22 = arith.constant 0 : index
      %c0_23 = arith.constant 0 : index
      %54 = vector.load %arg5[%c0_21, %c0_22, %c0_23] : memref<1x8x128xf32, #tpu.memory_space<vmem>>, vector<1x8x128xf32>
      tpu.vector_store %arg5[%c0_21, %c0_22, %c0_23], %53 {strides = array<i32>} : memref<1x8x128xf32, #tpu.memory_space<vmem>>, vector<1x8x128xf32>,
    } else {
    }
    return
  }
  func.func @transform_0(%arg0: i32, %arg1: i32) -> (i32, i32) {
    %c1_i32 = arith.constant 1 : i32
    %0 = arith.muli %arg0, %c1_i32 : i32
    %1 = arith.addi %0, %arg1 : i32
    %c0_i32 = arith.constant 0 : i32
    %c0_i32_0 = arith.constant 0 : i32
    return %1, %c0_i32 : i32, i32
  }
  func.func @transform_1(%arg0: i32, %arg1: i32) -> (i32, i32) {
    %c1_i32 = arith.constant 1 : i32
    %0 = arith.muli %arg0, %c1_i32 : i32
    %1 = arith.addi %0, %arg1 : i32
    %c0_i32 = arith.constant 0 : i32
    %c0_i32_0 = arith.constant 0 : i32
    return %1, %c0_i32 : i32, i32
  }
  func.func @transform_2(%arg0: i32, %arg1: i32) -> (i32, i32) {
    %c1_i32 = arith.constant 1 : i32
    %0 = arith.muli %arg0, %c1_i32 : i32
    %1 = arith.addi %0, %arg1 : i32
    %c0_i32 = arith.constant 0 : i32
    %c0_i32_0 = arith.constant 0 : i32
    return %1, %c0_i32 : i32, i32
  }
  func.func @transform_3(%arg0: i32, %arg1: i32) -> (i32, i32, i32) {
    %c0_i32 = arith.constant 0 : i32
    %c0_i32_0 = arith.constant 0 : i32
    %c0_i32_1 = arith.constant 0 : i32
    return %arg0, %c0_i32, %c0_i32_0 : i32, i32, i32
  }
}

</mosaic_0001>

<bundles_post_ra>
// kernel: tpu_custom_call.1
= control target key start
LH: loop header
LB: loop body
LE: loop exit
PB: predicated region body
PF: predicated region fallthrough
CT: control target
= control target key end

     0   :  { %8 = vsyncpa [#allocation4], 0  ;;  %s716_s0 = inlined_call_operand.vmem [shape: f32[16,4], index: 0, kind: input, shape index: {}]   ;;  %s717_s1 = inlined_call_operand.vmem [shape: s32[16,1], index: 1, kind: input, shape index: {}]   ;;  %s718_s2 = inlined_call_operand.vmem [shape: f32[16,1], index: 2, kind: input, shape index: {}]   ;;  %s719_s3 = inlined_call_operand.hbm [shape: f32[2,8,128], index: 3, kind: output, shape index: {}]  }
   0x1   :  { %10 = vsyncpa [#allocation4 + $0x1], 0  ;;  %s593_s12 = smov 0   ;;  %s595_s13 = smov 0  }
   0x2   :  { %s597_s14 = smov 0   ;;  %s599_s15 = smov 0  }
   0x3   :  { %s601_s16 = smov 0   ;;  %s603_s17 = smov 0  }
   0x4 LB: > { %s409_s18 = sadd.s32 4294967295, %s568_s17   ;;  %s410_s19 = sadd.s32 4294967294, %s568_s17   ;;  %s568_s17 = sphi %s603_s17, %s16_s17   ;;  %s564_s16 = sphi %s601_s16, %s726_s16   ;;  %s560_s15 = sphi %s599_s15, %s725_s15   ;;  %s556_s14 = sphi %s597_s14, %s724_s14   ;;  %s552_s13 = sphi %s595_s13, %s723_s13   ;;  %s548_s12 = sphi %s593_s12, %s722_s12  }
   0x5   : > { %s28_s20 = sadd.s32 1, %s564_s16  ;;  %s119_s21 = sadd.s32 1, %s556_s14 }
   0x6   : > { %p30_p0 = scmp.ge.s32.totalorder %s28_s20, 2  ;;  %p129_p1 = scmp.ne.s32.totalorder %s556_s14, %s552_s13 }
   0x7   : > { %p130_p2 = scmp.eq.s32.totalorder %s409_s18, 1  ;;  %p135_p3 = scmp.ne.s32.totalorder %s552_s13, %s548_s12 }
   0x8   : > { %s728_s20 = smov (%p30_p0, %s28_s20), 0  ;;  %p136_p5 = scmp.eq.s32.totalorder %s410_s19, 1 }
   0x9   : > { %p633_p4 = por %p130_p2, %p129_p1  ;;  %s116_s23 = ssub.s32 %s564_s16, %s728_s20 }
   0xa   : > { %p413_p6 = scmp.ge.s32.totalorder %s568_s17, 1  ;;  %p117_p7 = scmp.eq.s32.totalorder %s116_s23, 0 }
   0xb   : > { %p640_p8 = por %p136_p5, %p135_p3  ;;  %p181_p9 = scmp.lt.s32.totalorder %s568_s17, 3 }
   0xc   : > { %s646_s25 = scalar_select %p117_p7, %s556_s14, %s119_s21  }
   0xd   : > { %p182_p10 = pnand %p413_p6, %p181_p9 }
   0xe   : > { %p216_p11 = scmp.lt.s32.totalorder (!%p182_p10), %s560_s15, 1  ;;  %s419_s10 = sshll.u32 (!%p182_p10), %s560_s15, 3 }
   0xf   : > { %185 = sbr.rel (%p182_p10) target bundleno = 607 (0x25f), region = 32  ;;  %s212_s11 = sand.u32 (!%p182_p10), 1, %s552_s13  }
  0x10   : > { %s414_s18 = sshll.u32 (!%p182_p10), %s212_s11, 3  ;;  %s421_s23 = sshll.u32 (!%p182_p10), %s560_s15, 7 }
  0x11   : > { %s214_s19 = scalar_lea.vmem (!%p182_p10), [#allocation3], %s414_s18  ;;  %s316_s29 = scalar_lea.hbm (!%p182_p10), %s719_s3, %s421_s23 }
  0x12   : > { %s318_s21 = sshll.u32 (!%p182_p10), %s214_s19, 4  ;;  %s572_s5 = smov (!%p182_p10), [#allocation3]   ;;  %s673_s21 = int_to_ptr.vmem [resolvable:$true] %s318_s21 }
  0x13   : > { %s492_s4 = scalar_lea.vmem (!%p182_p10), %s673_s21, 128 }
  0x14   : > { %v570_v0 = vmov 0   ;;  %s217_s26 = scalar_select %p216_p11, %s560_s15, 1  ;;  %vm250_vm0 = vcmask 31744   ;;  %v242_v7 = vlaneseq  ;;  %v571_v10 = vmov 0.0  }
  0x15   : > { %483 = vset.pattern.permute.xlu0 %v570_v0  ;;  %vm237_vm2 = vcmask 7168   ;;  %v280_v30 = vstv %s419_s10  ;;  %p493_p12 = scmp.ne.s32.totalorder %s673_s21, %s492_s4  ;;  %s496_s15 = sshll.u32 %s572_s5, 4  ;;  %s497_s15 = int_to_ptr.vmem [resolvable:$false] %s496_s15 }
  0x16   : > { %s650_s27 = sshll.u32 %s217_s26, 3  ;;  %v243_v8 = vand.u32 127, %v242_v7  ;;  %238 = vst.msk [vmem:[#allocation2] sm:$0xff] %vm237_vm2, %v571_v10  ;;  %v277_v29 = vshrl.u32 %v242_v7, 7  ;;  %p499_p1 = scmp.lt.s32.totalorder %s673_s21, %s497_s15 }
  0x17   : > { %s219_s30 = scalar_lea.vmem %s716_s0, %s650_s27  ;;  %s225_s6 = scalar_lea.vmem %s717_s1, %s650_s27 }
  0x18   : > { %v239_v1 = vld [vmem:[%s219_s30] sm:$0xff]  ;;  %s231_s9 = scalar_lea.vmem %s718_s2, %s650_s27  ;;  %v281_v31 = vadd.s32 %v280_v30, %v277_v29  ;;  %s305_s30 = scalar_lea.sflag [#allocation4], %s212_s11 }
  0x19   : > { %v251_v2 = vsel %vm250_vm0, %v239_v1, -inf  ;;  %v240_v3 = vld [vmem:[%s225_s6] sm:$0xff]  ;;  %p494_p13 = pnand %p493_p12, %p633_p4  ;;  %s498_s6 = scalar_lea.vmem %s497_s15, 256 }
  0x1a   : > { %252 = vmax.xlane.f32.xlu0 %v251_v2  ;;  %v241_v25 = vld [vmem:[%s231_s9] sm:$0xff]  ;;  %vm282_vm3 = vcmp.lt.s32.totalorder %v281_v31, 8  ;;  %p500_p2 = scmp.lt.s32.totalorder %s498_s6, %s492_s4 }
  0x1b   : > { %p495_p0 = pneg %p494_p13 }
  0x1c   : > { %p501_p3 = por %p500_p2, %p499_p1 }
  0x1d   : > { %v284_v34 = vld [vmem:[#allocation2] sm:$0xff] }
  0x1e   : > { %p502_p5 = pnand %p501_p3, %p495_p0 }
  0x30   : > { %245 = vperm.xlu0 %483, %v240_v3  }
  0xa3   : > { %v253_v4 = vpop.xlane.xlu0 %252 }
  0xa4   : > { %v254_v5 = vsub.f32 %v239_v1, %v253_v4 }
  0xa6   : > { %v255_v6 = vmul.f32 1.442695, %v254_v5 }
  0xa8   : > { %484 = vpow2.f32 %v255_v6 }
  0xab   : > { %v246_v9 = vpop.permute.xlu0 %245 }
  0xac   : > { %vm247_vm1 = vcmp.eq.s32.totalorder %v243_v8, %v246_v9 }
  0xad   : > { %v418_v11 = vsel %vm247_vm1, 1.0, %v571_v10 }
  0xae   : > { %v263_v12 = vmul.f32 %v418_v11, %v239_v1 }
  0xb0   : > { %v264_v15 = vsel %vm250_vm0, %v263_v12, 0.0 }
  0xb5   : > { %v485_v13 = vpop.eup %484 }
  0xb6   : > { %v257_v14 = vsel %vm250_vm0, %v485_v13, 0.0 }
  0xb7   : > { %258 = vadd.xlane.f32.xlu1 %v257_v14 }
  0xbb   : > { %265 = vadd.xlane.f32.xlu1 %v264_v15 }
 0x140   : > { %v259_v16 = vpop.xlane.xlu1 %258 }
 0x141   : > { %486 = vlog2.f32 %v259_v16 }
 0x144   : > { %v266_v19 = vpop.xlane.xlu1 %265 }
 0x14e   : > { %v487_v17 = vpop.eup %486 }
 0x14f   : > { %v261_v18 = vmul.f32 0.6931472, %v487_v17 }
 0x151   : > { %v262_v20 = vadd.f32 %v261_v18, %v253_v4 }
 0x153   : > { %v267_v21 = vsub.f32 %v262_v20, %v266_v19 }
 0x155   : > { %v268_v22 = vsub.f32 0.0, %v267_v21 }
 0x157   : > { %v269_v23 = vmul.f32 1.442695, %v268_v22 }
 0x159   : > { %488 = vpow2.f32 %v269_v23 }
 0x166   : > { %v489_v24 = vpop.eup %488 }
 0x167   : > { %v271_v26 = vsub.f32 1.0, %v489_v24 }
 0x169   : > { %v272_v27 = vmul.f32 %v271_v26, %v241_v25 }
 0x16b   : > { %v273_v28 = vmul.f32 1.442695, %v272_v27 }
 0x16d   : > { %490 = vpow2.f32 %v273_v28 }
 0x17a   : > { %v491_v32 = vpop.eup %490 }
 0x17b   : > { %v275_v33 = vmul.f32 %v491_v32, %v267_v21 }
 0x17d   : > { %v283_v35 = vsel %vm282_vm3, %v275_v33, 0.0 }
 0x17e   : > { %v285_v36 = vadd.f32 %v284_v34, %v283_v35 }
 0x180   : > { %287 = vst.msk [vmem:[#allocation2] sm:$0xff] %vm237_vm2, %v285_v36 }
 0x187   : > { %v291_v37 = vld [vmem:[#allocation2] sm:$0xff] }
 0x188   : > { %v292_v38 = vsel %vm237_vm2, %v291_v37, 0.0 }
 0x189   : > { %293 = vadd.xlane.f32.xlu1 %v292_v38 }
 0x212   : > { %v294_v39 = vpop.xlane.xlu1 %293 }
 0x213   : > { %v295_v40 = vrot.slane %v294_v39, 4 }
 0x215   : > { %v296_v41 = vadd.f32 %v295_v40, %v294_v39 }
 0x217   : > { %v297_v42 = vrot.slane %v296_v41, 2 }
 0x219   : > { %v298_v43 = vadd.f32 %v297_v42, %v296_v41 }
 0x21b   : > { %v299_v44 = vrot.slane %v298_v43, 1 }
 0x21d   : > { %v300_v45 = vadd.f32 %v299_v44, %v298_v43 }
 0x21f   : > { %424 = vpush %v300_v45 }
 0x250   : > { %s425_s26 = spop %424 }
 0x251   : > { %v302_v46 = vstv %s425_s26 }
 0x252   : > { %303 = vst [vmem:[%s214_s19] sm:$0xff] %v302_v46 }
 0x253   : > { %505 = shalt.err (!%p502_p5)
}
 0x254   : > { %s506_s7 = scalar_lea.hbm %s316_s29, 128  ;;  %s510_s10 = scalar_lea.hbm %s719_s3, 256 }
 0x255   : > { %p507_p6 = scmp.ne.s32.totalorder %s316_s29, %s506_s7  ;;  %p511_p10 = scmp.lt.s32.totalorder %s316_s29, %s719_s3 }
 0x256   : > { %p512_p11 = scmp.lt.s32.totalorder %s510_s10, %s506_s7 }
 0x257   : > { %p508_p7 = pnand %p507_p6, %p633_p4 }
 0x258   : > { %p513_p12 = por %p512_p11, %p511_p10 }
 0x259   : > { %p509_p9 = pneg %p508_p7 }
 0x25b   : > { %p514_p13 = pnand %p513_p12, %p509_p9 }
 0x25d   : > { %517 = shalt.err (!%p514_p13)
}
 0x25e   : > { %426 = dma.vmem_to_hbm [thread:$0]  (%p633_p4), %s673_s21, 128, %s316_s29, %s305_s30  }
 0x25f PF: > { %p432_p0 = scmp.ge.s32.totalorder %s568_s17, 2  ;;  %s330_s19 = sand.u32 1, %s548_s12  }
 0x260   : > { %s331_s23 = scalar_lea.sflag [#allocation4], %s330_s19 }
 0x261   : > { %p429_p1 = pnand %p432_p0, %p640_p8 }
 0x263   : > { %p430_p2 = pneg %p429_p1 }
 0x265   : > { %543 = dma.done.wait (%p430_p2), %s331_s23, 128  }
 0x266   : > { %545 = vsyncadd (%p430_p2), %s331_s23, 4294967168  ;;  %s16_s17 = sadd.s32 1, %s568_s17   ;;  %s722_s12 = smov %s552_s13 }
 0x267   : > { %p13_p3 = scmp.ge.s32.totalorder %s16_s17, 4   ;;  %s723_s13 = smov %s556_s14 }
 0x268   : > { %s724_s14 = smov %s646_s25  ;;  %s725_s15 = smov %s564_s16 }
 0x269   : > { %s726_s16 = smov %s728_s20  ;;  %15 = sbr.rel (!%p13_p3) target bundleno = 4 (0x4), region = 81 }
 0x26e   :  { %336 = vsyncpa [#allocation4], 1 }
 0x26f   :  { %338 = vsyncpa [#allocation4 + $0x1], 1 }

</bundles_post_ra>
